<compile_context>
chip_gen: v6e
topology: v6e:2x2x1
jax: 0.10.0
libtpu: 0.0.40
codegen_flags: <defaults>
</compile_context>

<pallas_src>
import functools

import jax
import jax.numpy as jnp
from jax.experimental import pallas as pl
from jax.experimental.pallas import tpu as pltpu


def _nll_kernel(tgt_ref, x_ref, nll_ref, m_ref, l_ref, t_ref, *, vocab_size):
    """Online -log_softmax(x)[target] for one row tile, streamed over vocab tiles.

    Grid = (row_tiles, vocab_tiles); vocab is the inner 'arbitrary' reduction
    axis.  nll = logsumexp(x) - x[target].
    """
    kv = pl.program_id(1)

    @pl.when(kv == 0)
    def _init():
        m_ref[...] = jnp.full(m_ref.shape, -jnp.inf, dtype=m_ref.dtype)
        l_ref[...] = jnp.zeros(l_ref.shape, dtype=l_ref.dtype)
        t_ref[...] = jnp.zeros(t_ref.shape, dtype=t_ref.dtype)

    # Cast only the current tile (logits streamed in their native dtype).
    x = x_ref[...].astype(jnp.float32)                       # (TS, TV)
    ts_blk, tv_blk = x.shape

    # Global lane (vocab) index of every element in this tile.
    lane = jax.lax.broadcasted_iota(jnp.int32, (ts_blk, tv_blk), 1) + kv * tv_blk

    # Mask out-of-vocab lanes of the boundary tile (static no-op if V % TV == 0).
    if vocab_size % tv_blk != 0:
        x = jnp.where(lane < vocab_size, x, -jnp.inf)

    # ---- online logsumexp over the vocab axis ------------------------------
    m_old = m_ref[...]                                        # (TS, 1)
    m_new = jnp.maximum(m_old, jnp.max(x, axis=-1, keepdims=True))
    alpha = jnp.exp(m_old - m_new)                            # one rescale / row
    l_ref[...] = alpha * l_ref[...] + jnp.sum(
        jnp.exp(x - m_new), axis=-1, keepdims=True)           # one exp / element
    m_ref[...] = m_new

    # ---- gather x[target] for lanes owned by this vocab tile ---------------
    tgt = tgt_ref[...]                                        # (TS, 1) int32
    t_ref[...] += jnp.sum(jnp.where(lane == tgt, x, 0.0), axis=-1, keepdims=True)

    # ---- finalize: nll = lse - x[target] ------------------------------------
    @pl.when(kv == pl.num_programs(1) - 1)
    def _finalize():
        nll_ref[...] = (m_ref[...] + jnp.log(l_ref[...]) - t_ref[...]).astype(
            nll_ref.dtype)


def perplexity(logits, target, *, ts=512, tv=2048):
    """logits: [B, S, V] float, target: [B, S] int -> [B] float32 perplexity."""
    B, S, V = logits.shape
    N = B * S

    x = logits.reshape(N, V)                      # contiguous view, no copy
    tgt = target.reshape(N, 1).astype(jnp.int32)

    # ---- vocab tile: one tile if it fits, else a multiple of 128 ------------
    if V <= tv:
        tv = V                                    # block last dim == full dim
    else:
        tv = max(128, (tv // 128) * 128)          # lane-aligned, boundary masked

    # ---- row tile: multiple of 8 (or the whole dim when N < 8) --------------
    if N < 8:
        ts = N
    else:
        ts = min(ts, (N // 8) * 8)

    grid = (pl.cdiv(N, ts), pl.cdiv(V, tv))

    # Logits are double-buffered in their native dtype.
    itemsize = jnp.dtype(logits.dtype).itemsize
    need = 2 * ts * tv * itemsize + 2 * ts * 4 + 2 * ts * 4 + 3 * ts * 4 + (4 << 20)
    vmem_limit = int(min(max(need, 32 << 20), 56 << 20))   # stay under v7x 64 MiB

    kernel = functools.partial(_nll_kernel, vocab_size=V)

    nll = pl.pallas_call(
        kernel,
        out_shape=jax.ShapeDtypeStruct((N, 1), jnp.float32),
        grid=grid,
        in_specs=[
            pl.BlockSpec((ts, 1), lambda r, kv: (r, 0)),     # target indices
            pl.BlockSpec((ts, tv), lambda r, kv: (r, kv)),   # logits (native dtype)
        ],
        out_specs=pl.BlockSpec((ts, 1), lambda r, kv: (r, 0)),
        scratch_shapes=[
            pltpu.VMEM((ts, 1), jnp.float32),   # running max m
            pltpu.VMEM((ts, 1), jnp.float32),   # rescaled exp-sum l
            pltpu.VMEM((ts, 1), jnp.float32),   # accumulated target logit
        ],
        compiler_params=pltpu.CompilerParams(
            dimension_semantics=("parallel", "arbitrary"),
            vmem_limit_bytes=vmem_limit,
        ),
    )(tgt, x)

    # Tiny epilogue on B*S scalars: mean over the sequence, then exp.
    nll = nll[:, 0].reshape(B, S)
    return jnp.exp(jnp.mean(nll, axis=1))


def _reference_perplexity(logits, target):
    log_probs = jax.nn.log_softmax(logits.astype(jnp.float32), axis=-1)
    gathered = jnp.take_along_axis(
        log_probs, target[..., None].astype(jnp.int32), axis=2)[..., 0]
    return jnp.exp(jnp.mean(-gathered, axis=1))


if __name__ == "__main__":
    key = jax.random.PRNGKey(0)
    k1, k2, k3, k4, k5, k6 = jax.random.split(key, 6)

    # Case 1: toy shape matching the module docstring (single tile).
    B, S, V = 2, 8, 32
    logits = jax.random.normal(k1, (B, S, V), dtype=jnp.float32)
    target = jax.random.randint(k2, (B, S), 0, V, dtype=jnp.int32)
    out = jax.block_until_ready(perplexity(logits, target))
    ref = _reference_perplexity(logits, target)
    assert out.shape == (B,), out.shape
    assert jnp.allclose(out, ref, rtol=1e-4, atol=1e-4), (out, ref)

    # Case 2: bf16 streaming, forced multi-tile grid with a partial vocab tile
    # (exercises the in-kernel -inf boundary mask and online vocab reduction).
    B2, S2, V2 = 2, 20, 300
    logits2 = (4.0 * jax.random.normal(k3, (B2, S2, V2), dtype=jnp.float32)
               ).astype(jnp.bfloat16)
    target2 = jax.random.randint(k4, (B2, S2), 0, V2, dtype=jnp.int32)
    out2 = jax.block_until_ready(perplexity(logits2, target2, ts=8, tv=128))
    ref2 = _reference_perplexity(logits2.astype(jnp.float32), target2)
    assert jnp.allclose(out2, ref2, rtol=2e-2, atol=2e-2), (out2, ref2)

    # Case 3: row count not a multiple of the row tile (partial boundary row
    # block; garbage rows are never read back), default tiles.
    B3, S3, V3 = 3, 7, 520
    logits3 = jax.random.normal(k5, (B3, S3, V3), dtype=jnp.float32)
    target3 = jax.random.randint(k6, (B3, S3), 0, V3, dtype=jnp.int32)
    out3 = jax.block_until_ready(perplexity(logits3, target3))
    ref3 = _reference_perplexity(logits3, target3)
    assert jnp.allclose(out3, ref3, rtol=1e-4, atol=1e-4), (out3, ref3)

    print("KERNEL_OK")
</pallas_src>

<mosaic_0001>
module attributes {stable_mosaic.version = 11 : i64} {
  func.func @_nll_kernel(%arg0: i32, %arg1: i32, %arg2: memref<16x1xi32, #tpu.memory_space<vmem>>, %arg3: memref<16x32xf32, #tpu.memory_space<vmem>>, %arg4: memref<16x1xf32, #tpu.memory_space<vmem>>, %arg5: memref<16x1xf32, #tpu.memory_space<vmem>>, %arg6: memref<16x1xf32, #tpu.memory_space<vmem>>, %arg7: memref<16x1xf32, #tpu.memory_space<vmem>>) attributes {dimension_semantics = [#tpu.dimension_semantics<parallel>, #tpu.dimension_semantics<arbitrary>], iteration_bounds = array<i64: 1, 1>, scalar_prefetch = 0 : i64, scratch_operands = 3 : i64, tpu.core_type = #tpu.core_type<tc>, window_params = [{transform_indices = @transform_0, window_bounds = array<i64: 16, 1>}, {transform_indices = @transform_1, window_bounds = array<i64: 16, 32>}, {transform_indices = @transform_2, window_bounds = array<i64: 16, 1>}]} {
    %c0_i32 = arith.constant 0 : i32
    %0 = arith.cmpi eq, %arg1, %c0_i32 : i32
    %1 = arith.extui %0 : i1 to i32
    %c0_i32_0 = arith.constant 0 : i32
    %2 = arith.cmpi ne, %1, %c0_i32_0 : i32
    scf.if %2 {
      %cst_21 = arith.constant 0xFF800000 : f32
      %37 = vector.broadcast %cst_21 : f32 to vector<16x1xf32>
      %c0_22 = arith.constant 0 : index
      %c0_23 = arith.constant 0 : index
      %38 = vector.load %arg5[%c0_22, %c0_23] : memref<16x1xf32, #tpu.memory_space<vmem>>, vector<16x1xf32>
      tpu.vector_store %arg5[%c0_22, %c0_23], %37 {strides = array<i32>} : memref<16x1xf32, #tpu.memory_space<vmem>>, vector<16x1xf32>,
      %cst_24 = arith.constant 0.000000e+00 : f32
      %39 = vector.broadcast %cst_24 : f32 to vector<16x1xf32>
      %c0_25 = arith.constant 0 : index
      %c0_26 = arith.constant 0 : index
      %40 = vector.load %arg6[%c0_25, %c0_26] : memref<16x1xf32, #tpu.memory_space<vmem>>, vector<16x1xf32>
      tpu.vector_store %arg6[%c0_25, %c0_26], %39 {strides = array<i32>} : memref<16x1xf32, #tpu.memory_space<vmem>>, vector<16x1xf32>,
      %cst_27 = arith.constant 0.000000e+00 : f32
      %41 = vector.broadcast %cst_27 : f32 to vector<16x1xf32>
      %c0_28 = arith.constant 0 : index
      %c0_29 = arith.constant 0 : index
      %42 = vector.load %arg7[%c0_28, %c0_29] : memref<16x1xf32, #tpu.memory_space<vmem>>, vector<16x1xf32>
      tpu.vector_store %arg7[%c0_28, %c0_29], %41 {strides = array<i32>} : memref<16x1xf32, #tpu.memory_space<vmem>>, vector<16x1xf32>,
    } else {
    }
    %c0 = arith.constant 0 : index
    %c0_1 = arith.constant 0 : index
    %3 = vector.load %arg3[%c0, %c0_1] : memref<16x32xf32, #tpu.memory_space<vmem>>, vector<16x32xf32>
    %4 = tpu.iota {dimensions = array<i32: 1>} : vector<16x32xi32>
    %c32_i32 = arith.constant 32 : i32
    %5 = arith.muli %arg1, %c32_i32 : i32
    %6 = vector.broadcast %5 : i32 to vector<16x32xi32>
    %7 = arith.addi %4, %6 : vector<16x32xi32>
    %c0_2 = arith.constant 0 : index
    %c0_3 = arith.constant 0 : index
    %8 = vector.load %arg5[%c0_2, %c0_3] : memref<16x1xf32, #tpu.memory_space<vmem>>, vector<16x1xf32>
    %cst = arith.constant dense<0xFF800000> : vector<16xf32>
    %9 = vector.multi_reduction <maximumf>, %3, %cst [1] : vector<16x32xf32> to vector<16xf32>
    %10 = vector.shape_cast %9 : vector<16xf32> to vector<16x1xf32>
    %11 = arith.maximumf %8, %10 : vector<16x1xf32>
    %12 = arith.subf %8, %11 : vector<16x1xf32>
    %13 = math.exp %12 : vector<16x1xf32>
    %c0_4 = arith.constant 0 : index
    %c0_5 = arith.constant 0 : index
    %14 = vector.load %arg6[%c0_4, %c0_5] : memref<16x1xf32, #tpu.memory_space<vmem>>, vector<16x1xf32>
    %15 = arith.mulf %13, %14 : vector<16x1xf32>
    %16 = vector.broadcast %11 : vector<16x1xf32> to vector<16x32xf32>
    %17 = arith.subf %3, %16 : vector<16x32xf32>
    %18 = math.exp %17 : vector<16x32xf32>
    %cst_6 = arith.constant dense<0.000000e+00> : vector<16xf32>
    %19 = vector.multi_reduction <add>, %18, %cst_6 [1] : vector<16x32xf32> to vector<16xf32>
    %20 = vector.shape_cast %19 : vector<16xf32> to vector<16x1xf32>
    %21 = arith.addf %15, %20 : vector<16x1xf32>
    %c0_7 = arith.constant 0 : index
    %c0_8 = arith.constant 0 : index
    %22 = vector.load %arg6[%c0_7, %c0_8] : memref<16x1xf32, #tpu.memory_space<vmem>>, vector<16x1xf32>
    tpu.vector_store %arg6[%c0_7, %c0_8], %21 {strides = array<i32>} : memref<16x1xf32, #tpu.memory_space<vmem>>, vector<16x1xf32>,
    %c0_9 = arith.constant 0 : index
    %c0_10 = arith.constant 0 : index
    %23 = vector.load %arg5[%c0_9, %c0_10] : memref<16x1xf32, #tpu.memory_space<vmem>>, vector<16x1xf32>
    tpu.vector_store %arg5[%c0_9, %c0_10], %11 {strides = array<i32>} : memref<16x1xf32, #tpu.memory_space<vmem>>, vector<16x1xf32>,
    %c0_11 = arith.constant 0 : index
    %c0_12 = arith.constant 0 : index
    %24 = vector.load %arg2[%c0_11, %c0_12] : memref<16x1xi32, #tpu.memory_space<vmem>>, vector<16x1xi32>
    %c0_13 = arith.constant 0 : index
    %c0_14 = arith.constant 0 : index
    %25 = vector.load %arg7[%c0_13, %c0_14] : memref<16x1xf32, #tpu.memory_space<vmem>>, vector<16x1xf32>
    %26 = vector.broadcast %24 : vector<16x1xi32> to vector<16x32xi32>
    %27 = arith.cmpi eq, %7, %26 : vector<16x32xi32>
    %cst_15 = arith.constant 0.000000e+00 : f32
    %28 = vector.broadcast %cst_15 : f32 to vector<16x32xf32>
    %29 = arith.select %27, %3, %28 : vector<16x32xi1>, vector<16x32xf32>
    %cst_16 = arith.constant dense<0.000000e+00> : vector<16xf32>
    %30 = vector.multi_reduction <add>, %29, %cst_16 [1] : vector<16x32xf32> to vector<16xf32>
    %31 = vector.shape_cast %30 : vector<16xf32> to vector<16x1xf32>
    %32 = arith.addf %25, %31 : vector<16x1xf32>
    %c0_17 = arith.constant 0 : index
    %c0_18 = arith.constant 0 : index
    %33 = vector.load %arg7[%c0_17, %c0_18] : memref<16x1xf32, #tpu.memory_space<vmem>>, vector<16x1xf32>
    tpu.vector_store %arg7[%c0_17, %c0_18], %32 {strides = array<i32>} : memref<16x1xf32, #tpu.memory_space<vmem>>, vector<16x1xf32>,
    %c0_i32_19 = arith.constant 0 : i32
    %34 = arith.cmpi eq, %arg1, %c0_i32_19 : i32
    %35 = arith.extui %34 : i1 to i32
    %c0_i32_20 = arith.constant 0 : i32
    %36 = arith.cmpi ne, %35, %c0_i32_20 : i32
    scf.if %36 {
      %c0_21 = arith.constant 0 : index
      %c0_22 = arith.constant 0 : index
      %37 = vector.load %arg5[%c0_21, %c0_22] : memref<16x1xf32, #tpu.memory_space<vmem>>, vector<16x1xf32>
      %c0_23 = arith.constant 0 : index
      %c0_24 = arith.constant 0 : index
      %38 = vector.load %arg6[%c0_23, %c0_24] : memref<16x1xf32, #tpu.memory_space<vmem>>, vector<16x1xf32>
      %39 = math.log %38 : vector<16x1xf32>
      %40 = arith.addf %37, %39 : vector<16x1xf32>
      %c0_25 = arith.constant 0 : index
      %c0_26 = arith.constant 0 : index
      %41 = vector.load %arg7[%c0_25, %c0_26] : memref<16x1xf32, #tpu.memory_space<vmem>>, vector<16x1xf32>
      %42 = arith.subf %40, %41 : vector<16x1xf32>
      %c0_27 = arith.constant 0 : index
      %c0_28 = arith.constant 0 : index
      %43 = vector.load %arg4[%c0_27, %c0_28] : memref<16x1xf32, #tpu.memory_space<vmem>>, vector<16x1xf32>
      tpu.vector_store %arg4[%c0_27, %c0_28], %42 {strides = array<i32>} : memref<16x1xf32, #tpu.memory_space<vmem>>, vector<16x1xf32>,
    } else {
    }
    return
  }
  func.func @transform_0(%arg0: i32, %arg1: i32) -> (i32, i32) {
    %c0_i32 = arith.constant 0 : i32
    %c0_i32_0 = arith.constant 0 : i32
    return %arg0, %c0_i32 : i32, i32
  }
  func.func @transform_1(%arg0: i32, %arg1: i32) -> (i32, i32) {
    %c0_i32 = arith.constant 0 : i32
    return %arg0, %arg1 : i32, i32
  }
  func.func @transform_2(%arg0: i32, %arg1: i32) -> (i32, i32) {
    %c0_i32 = arith.constant 0 : i32
    %c0_i32_0 = arith.constant 0 : i32
    return %arg0, %c0_i32 : i32, i32
  }
}

</mosaic_0001>

<bundles_post_ra>
// kernel: tpu_custom_call.1
= control target key start
LH: loop header
LB: loop body
LE: loop exit
PB: predicated region body
PF: predicated region fallthrough
CT: control target
= control target key end

     0   :  { %vm31_vm0 = vcmask 261120   ;;  %vm15_vm1 = vcmask 7168   ;;  %v143_v2 = vmov -inf   ;;  %v144_v5 = vmov 0   ;;  %s199_s1 = inlined_call_operand.vmem [shape: f32[16,32], index: 1, kind: input, shape index: {}]   ;;  %s200_s0 = inlined_call_operand.vmem [shape: s32[16,1], index: 0, kind: input, shape index: {}]   ;;  %s201_s2 = inlined_call_operand.vmem [shape: f32[16,1], index: 2, kind: output, shape index: {}]  }
   0x1   :  { %v22_v0 = vld [vmem:[%s199_s1] sm:$0xff]  ;;  %v23_v1 = vld [vmem:[%s199_s1 + $0x8] sm:$0xff]  ;;  %16 = vst.msk [vmem:[#allocation2] sm:$0xff] %vm15_vm1, %v143_v2  ;;  %17 = vst.msk [vmem:[#allocation2 + $0x8] sm:$0xff] %vm15_vm1, %v143_v2  ;;  %129 = vset.pattern.permute.xlu1 %v144_v5  ;;  %130 = vset.pattern.permute.xlu0 %v144_v5  ;;  %v145_v6 = vmov 0.0   ;;  %v24_v17 = vlaneseq }
   0x2   :  { %v32_v3 = vsel %vm31_vm0, %v22_v0, -inf  ;;  %v35_v4 = vsel %vm31_vm0, %v23_v1, -inf  ;;  %18 = vst.msk [vmem:[#allocation3] sm:$0xff] %vm15_vm1, %v145_v6  ;;  %19 = vst.msk [vmem:[#allocation3 + $0x8] sm:$0xff] %vm15_vm1, %v145_v6  ;;  %v79_v7 = vld [vmem:[%s200_s0] sm:$0xff]  ;;  %v80_v16 = vld [vmem:[%s200_s0 + $0x8] sm:$0xff] }
   0x3   :  { %33 = vmax.xlane.f32.xlu0 %v32_v3  ;;  %20 = vst.msk [vmem:[#allocation4] sm:$0xff] %vm15_vm1, %v145_v6  ;;  %21 = vst.msk [vmem:[#allocation4 + $0x8] sm:$0xff] %vm15_vm1, %v145_v6  ;;  %v25_v18 = vand.u32 127, %v24_v17 }
   0x7   :  { %36 = vmax.xlane.f32.xlu0 %v35_v4 }
   0x8   :  { %v29_v8 = vld [vmem:[#allocation2] sm:$0xff]  ;;  %v30_v11 = vld [vmem:[#allocation2 + $0x8] sm:$0xff] }
   0x9   :  { %v46_v41 = vld [vmem:[#allocation3] sm:$0xff]  ;;  %v47_v45 = vld [vmem:[#allocation3 + $0x8] sm:$0xff] }
   0xa   :  { %v81_v35 = vld [vmem:[#allocation4] sm:$0xff]  ;;  %v82_v50 = vld [vmem:[#allocation4 + $0x8] sm:$0xff] }
  0x1d   :  { %84 = vperm.xlu0 %130, %v79_v7  }
  0x8c   :  { %v34_v9 = vpop.xlane.xlu0 %33 }
  0x8d   :  { %v38_v10 = vmax.f32 %v29_v8, %v34_v9 }
  0x8f   :  { %v40_v12 = vsub.f32 %v29_v8, %v38_v10  ;;  %77 = vst.msk [vmem:[#allocation2] sm:$0xff] %vm15_vm1, %v38_v10  ;;  %52 = vperm.xlu1 %129, %v38_v10  }
  0x90   :  { %v37_v13 = vpop.xlane.xlu0 %36 }
  0x91   :  { %v39_v14 = vmax.f32 %v30_v11, %v37_v13  ;;  %v42_v38 = vmul.f32 1.442695, %v40_v12 }
  0x93   :  { %v41_v15 = vsub.f32 %v30_v11, %v39_v14  ;;  %78 = vst.msk [vmem:[#allocation2 + $0x8] sm:$0xff] %vm15_vm1, %v39_v14  ;;  %57 = vperm.xlu1 %129, %v39_v14  }
  0x95   :  { %v44_v39 = vmul.f32 1.442695, %v41_v15 }
  0x96   :  { %v106_v57 = vld [vmem:[#allocation2] sm:$0xff] }
  0x97   :  { %87 = vperm.xlu1 %129, %v80_v16  }
  0x98   :  { %v85_v19 = vpop.permute.xlu0 %84 }
  0x99   :  { %vm89_vm2 = vcmp.eq.s32.totalorder %v25_v18, %v85_v19 }
  0x9a   :  { %v91_v20 = vsel %vm89_vm2, %v22_v0, 0.0  ;;  %v107_v63 = vld [vmem:[#allocation2 + $0x8] sm:$0xff] }
  0x9b   :  { %v93_v21 = vsel %vm31_vm0, %v91_v20, 0.0 }
  0x9c   :  { %94 = vadd.xlane.f32.xlu0 %v93_v21 }
 0x10a   :  { %v53_v22 = vpop.permute.xlu1 %52 }
 0x10b   :  { %v60_v23 = vsub.f32 %v22_v0, %v53_v22 }
 0x10d   :  { %v62_v24 = vmul.f32 1.442695, %v60_v23 }
 0x10e   :  { %v58_v25 = vpop.permute.xlu1 %57 }
 0x10f   :  { %131 = vpow2.f32 %v62_v24  ;;  %v61_v26 = vsub.f32 %v23_v1, %v58_v25 }
 0x111   :  { %v64_v27 = vmul.f32 1.442695, %v61_v26 }
 0x112   :  { %v88_v29 = vpop.permute.xlu1 %87 }
 0x113   :  { %133 = vpow2.f32 %v64_v27  ;;  %vm90_vm3 = vcmp.eq.s32.totalorder %v25_v18, %v88_v29 }
 0x114   :  { %v92_v33 = vsel %vm90_vm3, %v23_v1, 0.0  ;;  %135 = vpow2.f32 %v42_v38 }
 0x115   :  { %v96_v34 = vsel %vm31_vm0, %v92_v33, 0.0  ;;  %137 = vpow2.f32 %v44_v39 }
 0x11c   :  { %v132_v28 = vpop.eup %131 }
 0x11d   :  { %v66_v30 = vsel %vm31_vm0, %v132_v28, 0.0 }
 0x11e   :  { %67 = vadd.xlane.f32.xlu1 %v66_v30 }
 0x120   :  { %v134_v31 = vpop.eup %133 }
 0x121   :  { %v69_v32 = vsel %vm31_vm0, %v134_v31, 0.0  ;;  %v136_v40 = vpop.eup %135 }
 0x122   :  { %70 = vadd.xlane.f32.xlu1 %v69_v32  ;;  %v48_v42 = vmul.f32 %v136_v40, %v46_v41  ;;  %v138_v43 = vpop.eup %137 }
 0x123   :  { %v49_v47 = vmul.f32 %v138_v43, %v47_v45 }
 0x125   :  { %v95_v36 = vpop.xlane.xlu0 %94 }
 0x126   :  { %97 = vadd.xlane.f32.xlu1 %v96_v34  ;;  %v99_v37 = vadd.f32 %v95_v36, %v81_v35 }
 0x128   :  { %101 = vst.msk [vmem:[#allocation4] sm:$0xff] %vm15_vm1, %v99_v37 }
 0x12f   :  { %v116_v58 = vld [vmem:[#allocation4] sm:$0xff] }
 0x1a7   :  { %v68_v44 = vpop.xlane.xlu1 %67 }
 0x1a8   :  { %v72_v46 = vadd.f32 %v68_v44, %v48_v42 }
 0x1aa   :  { %75 = vst.msk [vmem:[#allocation3] sm:$0xff] %vm15_vm1, %v72_v46 }
 0x1ab   :  { %v71_v48 = vpop.xlane.xlu1 %70 }
 0x1ac   :  { %v73_v49 = vadd.f32 %v71_v48, %v49_v47 }
 0x1ae   :  { %76 = vst.msk [vmem:[#allocation3 + $0x8] sm:$0xff] %vm15_vm1, %v73_v49 }
 0x1af   :  { %v98_v51 = vpop.xlane.xlu1 %97 }
 0x1b0   :  { %v100_v52 = vadd.f32 %v98_v51, %v82_v50 }
 0x1b1   :  { %v108_v53 = vld [vmem:[#allocation3] sm:$0xff] }
 0x1b2   :  { %139 = vlog2.f32 %v108_v53  ;;  %102 = vst.msk [vmem:[#allocation4 + $0x8] sm:$0xff] %vm15_vm1, %v100_v52 }
 0x1b5   :  { %v109_v54 = vld [vmem:[#allocation3 + $0x8] sm:$0xff] }
 0x1b6   :  { %141 = vlog2.f32 %v109_v54 }
 0x1b9   :  { %v117_v1 = vld [vmem:[#allocation4 + $0x8] sm:$0xff] }
 0x1bf   :  { %v140_v55 = vpop.eup %139 }
 0x1c0   :  { %v111_v56 = vmul.f32 0.6931472, %v140_v55 }
 0x1c2   :  { %v114_v59 = vadd.f32 %v111_v56, %v106_v57 }
 0x1c3   :  { %v142_v60 = vpop.eup %141 }
 0x1c4   :  { %v113_v61 = vmul.f32 0.6931472, %v142_v60  ;;  %v118_v62 = vsub.f32 %v114_v59, %v116_v58 }
 0x1c6   :  { %v115_v0 = vadd.f32 %v113_v61, %v107_v63  ;;  %120 = vst.msk [vmem:[%s201_s2] sm:$0xff] %vm15_vm1, %v118_v62 }
 0x1c8   :  { %v119_v2 = vsub.f32 %v115_v0, %v117_v1 }
 0x1ca   :  { %121 = vst.msk [vmem:[%s201_s2 + $0x8] sm:$0xff] %vm15_vm1, %v119_v2 }

</bundles_post_ra>
